<compile_context>
chip_gen: v6e
topology: v6e:2x2x1
jax: 0.10.0
libtpu: 0.0.40
codegen_flags: <defaults>
</compile_context>

<pallas_src>
import jax
import jax.numpy as jnp
from jax.experimental import pallas as pl
from jax.experimental.pallas import tpu as pltpu


def _attn_gated_kernel(x_ref, wab_ref, bab_ref, wct_ref, bc_ref, a_out_ref):
    """One tile of TILE_N instances.

    x_ref   : [TILE_N, L]         input dtype (cast to bf16 for the MXU)
    wab_ref : [L, 2*D]   bf16     (Wa | Wb packed column-wise)
    bab_ref : [1, 2*D]   f32      (ba | bb)
    wct_ref : [n_classes, D] f32  (Wc transposed -> lane-dense rows)
    bc_ref  : [1, n_classes] f32
    a_out   : [TILE_N, n_classes]
    """
    d = wab_ref.shape[1] // 2
    n_classes = wct_ref.shape[0]

    # One fused [TILE_N, L] @ [L, 2D] bf16 matmul on the MXU, f32 accumulation.
    x_bf16 = x_ref[...].astype(jnp.bfloat16)
    ab = jnp.dot(x_bf16, wab_ref[...], preferred_element_type=jnp.float32)
    ab = ab + bab_ref[...]                                   # [TILE_N, 2D] f32

    a = jnp.tanh(ab[:, :d])                                  # [TILE_N, D]
    # sigmoid(z) == 0.5 * (tanh(0.5 * z) + 1)  -> single EUP transcendental
    b = 0.5 * (jnp.tanh(0.5 * ab[:, d:]) + 1.0)              # [TILE_N, D]
    gated = a * b                                            # [TILE_N, D] f32

    if n_classes == 1:
        # Tiny projection: keep it off the MXU (would use 1 of 128/256 output lanes).
        A = jnp.sum(gated * wct_ref[...], axis=-1, keepdims=True) + bc_ref[...]
    else:
        A = jax.lax.dot_general(
            gated, wct_ref[...],
            dimension_numbers=(((1,), (1,)), ((), ())),
            preferred_element_type=jnp.float32) + bc_ref[...]

    a_out_ref[...] = A.astype(a_out_ref.dtype)


def attn_net_gated_forward(x, params, *, tile_n=1024, vmem_limit_bytes=None):
    """Gated attention forward pass. Returns (A, x) like the PyTorch module.

    tile_n: rows of x per grid step. Guidance: ~2048-4096 (v5e), ~2048-8192 (v6e),
            ~1024-2048 (v7x, 64 MiB VMEM). Default 1024 is safe on all generations.
    """
    wa, ba, wb, bb, wc, bc = params
    N, L = x.shape
    D = wa.shape[1]
    n_classes = wc.shape[1]

    # Tile size: full array if it fits one tile, else keep sublane alignment (16
    # covers both f32 and bf16 packing).
    if tile_n >= N:
        tile_n = N
    else:
        tile_n = max(16, (tile_n // 16) * 16)
    grid = (pl.cdiv(N, tile_n),)

    # Host-side (one-time) weight packing / casting.
    wab = jnp.concatenate([wa, wb], axis=1).astype(jnp.bfloat16)   # [L, 2D]
    bab = jnp.concatenate([ba, bb], axis=1).astype(jnp.float32)    # [1, 2D]
    wct = jnp.transpose(wc).astype(jnp.float32)                    # [n_classes, D]
    bc32 = bc.astype(jnp.float32)                                  # [1, n_classes]

    cp_kwargs = dict(dimension_semantics=("parallel",))
    if vmem_limit_bytes is not None:
        cp_kwargs["vmem_limit_bytes"] = vmem_limit_bytes

    A = pl.pallas_call(
        _attn_gated_kernel,
        out_shape=jax.ShapeDtypeStruct((N, n_classes), x.dtype),
        grid_spec=pltpu.PrefetchScalarGridSpec(
            num_scalar_prefetch=0,
            grid=grid,
            in_specs=[
                pl.BlockSpec((tile_n, L), lambda i: (i, 0)),           # x (tiled over N)
                pl.BlockSpec((L, 2 * D), lambda i: (0, 0)),            # Wa|Wb (resident)
                pl.BlockSpec((1, 2 * D), lambda i: (0, 0)),            # ba|bb
                pl.BlockSpec((n_classes, D), lambda i: (0, 0)),        # Wc^T
                pl.BlockSpec((1, n_classes), lambda i: (0, 0)),        # bc
            ],
            out_specs=pl.BlockSpec((tile_n, n_classes), lambda i: (i, 0)),
        ),
        compiler_params=pltpu.CompilerParams(**cp_kwargs),
    )(x, wab, bab, wct, bc32)
    return A, x


def init_params(key, L, D, n_classes, dtype=jnp.float32):
    """Deterministic init mirroring nn.Linear defaults: U(-1/sqrt(fan_in), 1/sqrt(fan_in))."""
    ks = jax.random.split(key, 6)
    bound_L = 1.0 / (L ** 0.5)
    bound_D = 1.0 / (D ** 0.5)
    # stored as [in, out] (transposed relative to PyTorch's [out, in])
    wa = jax.random.uniform(ks[0], (L, D), dtype, -bound_L, bound_L)
    ba = jax.random.uniform(ks[1], (1, D), dtype, -bound_L, bound_L)
    wb = jax.random.uniform(ks[2], (L, D), dtype, -bound_L, bound_L)
    bb = jax.random.uniform(ks[3], (1, D), dtype, -bound_L, bound_L)
    wc = jax.random.uniform(ks[4], (D, n_classes), dtype, -bound_D, bound_D)
    bc = jax.random.uniform(ks[5], (1, n_classes), dtype, -bound_D, bound_D)
    return (wa, ba, wb, bb, wc, bc)


def reference_forward(x, params):
    wa, ba, wb, bb, wc, bc = params
    a = jnp.tanh(x @ wa + ba)
    b = jax.nn.sigmoid(x @ wb + bb)
    A = (a * b) @ wc + bc
    return A, x


if __name__ == "__main__":
    # Small shapes consistent with the module (L=512, D=256 scaled down); N is not a
    # multiple of the tile so the partial-tile path is exercised too.
    N, L, D, n_classes = 200, 64, 32, 1
    TILE_N = 64

    key = jax.random.PRNGKey(0)
    k_x, k_p = jax.random.split(key)
    x = jax.random.normal(k_x, (N, L), jnp.float32)
    params = init_params(k_p, L, D, n_classes)

    A, x_out = attn_net_gated_forward(x, params, tile_n=TILE_N)
    A = jax.block_until_ready(A)
    x_out = jax.block_until_ready(x_out)

    A_ref, _ = reference_forward(x, params)
    assert A.shape == (N, n_classes)
    assert x_out.shape == (N, L)
    # Loose tolerance: matmul operands are bf16 (f32 accumulation); activations f32.
    assert jnp.allclose(A, A_ref, atol=2e-2, rtol=2e-2), "mismatch vs reference"
    assert jnp.array_equal(x_out, x), "passthrough x mismatch"

    print("KERNEL_OK")
</pallas_src>

<mosaic_0001>
module attributes {stable_mosaic.version = 11 : i64} {
  func.func @_attn_gated_kernel(%arg0: i32, %arg1: memref<64x64xf32, #tpu.memory_space<vmem>>, %arg2: memref<64x64xbf16, #tpu.memory_space<vmem>>, %arg3: memref<1x64xf32, #tpu.memory_space<vmem>>, %arg4: memref<1x32xf32, #tpu.memory_space<vmem>>, %arg5: memref<1x1xf32, #tpu.memory_space<vmem>>, %arg6: memref<64x1xf32, #tpu.memory_space<vmem>>) attributes {dimension_semantics = [#tpu.dimension_semantics<parallel>], iteration_bounds = array<i64: 4>, scalar_prefetch = 0 : i64, scratch_operands = 0 : i64, tpu.core_type = #tpu.core_type<tc>, window_params = [{transform_indices = @transform_0, window_bounds = array<i64: 64, 64>}, {pipeline_mode = #tpu.pipeline_mode<synchronous>, transform_indices = @transform_1, window_bounds = array<i64: 64, 64>}, {pipeline_mode = #tpu.pipeline_mode<synchronous>, transform_indices = @transform_2, window_bounds = array<i64: 1, 64>}, {pipeline_mode = #tpu.pipeline_mode<synchronous>, transform_indices = @transform_3, window_bounds = array<i64: 1, 32>}, {pipeline_mode = #tpu.pipeline_mode<synchronous>, transform_indices = @transform_4, window_bounds = array<i64: 1, 1>}, {transform_indices = @transform_5, window_bounds = array<i64: 64, 1>}]} {
    %c0 = arith.constant 0 : index
    %c0_0 = arith.constant 0 : index
    %0 = vector.load %arg1[%c0, %c0_0] : memref<64x64xf32, #tpu.memory_space<vmem>>, vector<64x64xf32>
    %1 = arith.truncf %0 : vector<64x64xf32> to vector<64x64xbf16>
    %c0_1 = arith.constant 0 : index
    %c0_2 = arith.constant 0 : index
    %2 = vector.load %arg2[%c0_1, %c0_2] : memref<64x64xbf16, #tpu.memory_space<vmem>>, vector<64x64xbf16>
    %cst = arith.constant dense<0.000000e+00> : vector<64x64xf32>
    %3 = tpu.matmul %1, %2, %cst {dimension_numbers = #tpu.dot_dimension_numbers<[1], [0], [0], [1], [0, 0, 1, 1], [], []>} : vector<64x64xbf16>, vector<64x64xbf16>, vector<64x64xf32> -> vector<64x64xf32>
    %c0_3 = arith.constant 0 : index
    %c0_4 = arith.constant 0 : index
    %4 = vector.load %arg3[%c0_3, %c0_4] : memref<1x64xf32, #tpu.memory_space<vmem>>, vector<1x64xf32>
    %5 = vector.broadcast %4 : vector<1x64xf32> to vector<64x64xf32>
    %6 = arith.addf %3, %5 : vector<64x64xf32>
    %7 = vector.extract_strided_slice %6 {offsets = [0, 0], sizes = [64, 32], strides = [1, 1]} : vector<64x64xf32> to vector<64x32xf32>
    %8 = math.tanh %7 : vector<64x32xf32>
    %9 = vector.extract_strided_slice %6 {offsets = [0, 32], sizes = [64, 32], strides = [1, 1]} : vector<64x64xf32> to vector<64x32xf32>
    %cst_5 = arith.constant 5.000000e-01 : f32
    %10 = vector.broadcast %cst_5 : f32 to vector<64x32xf32>
    %11 = arith.mulf %10, %9 : vector<64x32xf32>
    %12 = math.tanh %11 : vector<64x32xf32>
    %cst_6 = arith.constant 1.000000e+00 : f32
    %13 = vector.broadcast %cst_6 : f32 to vector<64x32xf32>
    %14 = arith.addf %12, %13 : vector<64x32xf32>
    %cst_7 = arith.constant 5.000000e-01 : f32
    %15 = vector.broadcast %cst_7 : f32 to vector<64x32xf32>
    %16 = arith.mulf %15, %14 : vector<64x32xf32>
    %17 = arith.mulf %8, %16 : vector<64x32xf32>
    %c0_8 = arith.constant 0 : index
    %c0_9 = arith.constant 0 : index
    %18 = vector.load %arg4[%c0_8, %c0_9] : memref<1x32xf32, #tpu.memory_space<vmem>>, vector<1x32xf32>
    %19 = vector.broadcast %18 : vector<1x32xf32> to vector<64x32xf32>
    %20 = arith.mulf %17, %19 : vector<64x32xf32>
    %cst_10 = arith.constant dense<0.000000e+00> : vector<64xf32>
    %21 = vector.multi_reduction <add>, %20, %cst_10 [1] : vector<64x32xf32> to vector<64xf32>
    %22 = vector.shape_cast %21 : vector<64xf32> to vector<64x1xf32>
    %c0_11 = arith.constant 0 : index
    %c0_12 = arith.constant 0 : index
    %23 = vector.load %arg5[%c0_11, %c0_12] : memref<1x1xf32, #tpu.memory_space<vmem>>, vector<1x1xf32>
    %24 = vector.broadcast %23 : vector<1x1xf32> to vector<64x1xf32>
    %25 = arith.addf %22, %24 : vector<64x1xf32>
    %c0_13 = arith.constant 0 : index
    %c0_14 = arith.constant 0 : index
    %26 = vector.load %arg6[%c0_13, %c0_14] : memref<64x1xf32, #tpu.memory_space<vmem>>, vector<64x1xf32>
    tpu.vector_store %arg6[%c0_13, %c0_14], %25 {strides = array<i32>} : memref<64x1xf32, #tpu.memory_space<vmem>>, vector<64x1xf32>,
    return
  }
  func.func @transform_0(%arg0: i32) -> (i32, i32) {
    %c0_i32 = arith.constant 0 : i32
    %c0_i32_0 = arith.constant 0 : i32
    return %arg0, %c0_i32 : i32, i32
  }
  func.func @transform_1(%arg0: i32) -> (i32, i32) {
    %c0_i32 = arith.constant 0 : i32
    %c0_i32_0 = arith.constant 0 : i32
    %c0_i32_1 = arith.constant 0 : i32
    return %c0_i32, %c0_i32_0 : i32, i32
  }
  func.func @transform_2(%arg0: i32) -> (i32, i32) {
    %c0_i32 = arith.constant 0 : i32
    %c0_i32_0 = arith.constant 0 : i32
    %c0_i32_1 = arith.constant 0 : i32
    return %c0_i32, %c0_i32_0 : i32, i32
  }
  func.func @transform_3(%arg0: i32) -> (i32, i32) {
    %c0_i32 = arith.constant 0 : i32
    %c0_i32_0 = arith.constant 0 : i32
    %c0_i32_1 = arith.constant 0 : i32
    return %c0_i32, %c0_i32_0 : i32, i32
  }
  func.func @transform_4(%arg0: i32) -> (i32, i32) {
    %c0_i32 = arith.constant 0 : i32
    %c0_i32_0 = arith.constant 0 : i32
    %c0_i32_1 = arith.constant 0 : i32
    return %c0_i32, %c0_i32_0 : i32, i32
  }
  func.func @transform_5(%arg0: i32) -> (i32, i32) {
    %c0_i32 = arith.constant 0 : i32
    %c0_i32_0 = arith.constant 0 : i32
    return %arg0, %c0_i32 : i32, i32
  }
}

</mosaic_0001>

<bundles_post_ra>
// kernel: tpu_custom_call.1
= control target key start
LH: loop header
LB: loop body
LE: loop exit
PB: predicated region body
PF: predicated region fallthrough
CT: control target
= control target key end

     0   :  { %s1230_s0 = inlined_call_operand.vmem [shape: f32[200,64], index: 0, kind: input, shape index: {}]   ;;  %s1231_s1 = inlined_call_operand.vmem [shape: bf16[64,64], index: 1, kind: input, shape index: {}]   ;;  %s1232_s2 = inlined_call_operand.vmem [shape: f32[1,64], index: 2, kind: input, shape index: {}]   ;;  %s1233_s3 = inlined_call_operand.vmem [shape: f32[1,32], index: 3, kind: input, shape index: {}]   ;;  %s1234_s4 = inlined_call_operand.<no memory space> [shape: f32[1,1], index: 4, kind: input, shape index: {}]   ;;  %s1235_s5 = inlined_call_operand.vmem [shape: f32[200,1], index: 5, kind: output, shape index: {}]  }
   0x1   :  { %v10_v0 = vstv %s1234_s4 }
   0x2   :  { %11 = vst [vmem:[#allocation2] sm:$0x1] %v10_v0 }
   0x3   :  { %s1083_s20 = smov 0   ;;  %s1085_s21 = smov 0  }
   0x4   :  { %s1087_s22 = smov 0  }
   0x5 LB: > { %s1096_s4 = sadd.s32 4294967295, %s1015_s22   ;;  %s1098_s23 = sadd.s32 1, %s1015_s22   ;;  %s1015_s22 = sphi %s1087_s22, %s1242_s22   ;;  %s1011_s21 = sphi %s1085_s21, %s1241_s21   ;;  %s1007_s20 = sphi %s1083_s20, %s1240_s20  }
   0x6   : > { %s131_s24 = ssub.s32 %s1015_s22, %s1098_s23  ;;  %s134_s25 = sadd.s32 1, %s1011_s21 }
   0x7   : > { %p132_p0 = scmp.eq.s32.totalorder %s131_s24, 0  ;;  %p144_p1 = scmp.ne.s32.totalorder %s1011_s21, %s1007_s20 }
   0x8   : > { %p145_p2 = scmp.eq.s32.totalorder %s1096_s4, 3  ;;  %p769_p3 = scmp.ge.s32.totalorder %s1015_s22, 1 }
   0x9   : > { %s1106_s26 = scalar_select %p132_p0, %s1011_s21, %s134_s25  }
   0xa   : > { %p1108_p4 = por %p145_p2, %p144_p1  ;;  %p198_p5 = scmp.lt.s32.totalorder %s1015_s22, 5 }
   0xc   : > { %p199_p6 = pnand %p769_p3, %p198_p5 }
   0xd   : > { %s1116_s30 = sshll.u32 (!%p199_p6), %s1096_s4, 3  ;;  %s1049_s19 = smov (!%p199_p6), 96  }
   0xe   : > { %202 = sbr.rel (%p199_p6) target bundleno = 567 (0x237), region = 40  ;;  %p234_p7 = scmp.lt.s32.totalorder (!%p199_p6), %s1116_s30, 24 }
   0xf   : > { %s226_s25 = sand.u32 (!%p199_p6), 1, %s1007_s20  }
  0x10   : > { %s770_s28 = sshll.u32 (!%p199_p6), %s226_s25, 6 }
  0x11   : > { %s1151_s29 = scalar_lea.vmem (!%p199_p6), [#allocation3], %s770_s28  }
  0x13   : > { %v925_v1 = vld [vmem:[%s1231_s1 + $0x18] sm:$0xff]   ;;  %v926_v2 = vld [vmem:[%s1231_s1 + $0x10] sm:$0xff]   ;;  %s235_s8 = scalar_select %p234_p7, %s1116_s30, 24  ;;  %v927_v3 = vld [vmem:[%s1231_s1 + $0x8] sm:$0xff]   ;;  %vm300_vm0 = vcmask 523264   ;;  %vm473_vm1 = vcmask 261120  }
  0x14   : > { %812 = vmatprep.subr.bf16.mxu0 %v925_v1  ;;  %828 = vmatprep.subr.bf16.mxu1 %v925_v1  ;;  %v928_v7 = vld [vmem:[%s1231_s1] sm:$0xff]   ;;  %vm513_vm2 = vcmask 7168   ;;  %s530_s20 = ssub.s32 (%p1108_p4), 25, %s1116_s30  ;;  %s801_s6 = sshll.u32 (%p1108_p4), %s1096_s4, 6 }
  0x15   : > { %813 = vmatpush3.bf16.msra.mxu0 %v925_v1  ;;  %832 = vmatpush3.bf16.msra.mxu1 %v925_v1  ;;  %s772_s11 = sshll.u32 %s235_s8, 3  ;;  %v773_v17 = vld [vmem:[%s1232_s2] ss:$0 sm:$0xff]  ;;  %p531_p8 = scmp.lt.s32.totalorder (%p1108_p4), %s530_s20, 8 }
  0x16   : > { %814 = vmatprep.subr.bf16.mxu0 %v926_v2  ;;  %829 = vmatprep.subr.bf16.mxu1 %v926_v2  ;;  %s237_s14 = scalar_lea.vmem %s1230_s0, %s772_s11  ;;  %s1176_s9 = scalar_lea.vmem (%p1108_p4), %s1235_s5, %s801_s6  }
  0x17   : > { %v249_v4 = vld [vmem:[%s237_s14] sm:$0xff]  ;;  %v250_v5 = vld [vmem:[%s237_s14 + $0x8] sm:$0xff]  ;;  %v251_v11 = vld [vmem:[%s237_s14 + $0x10] sm:$0xff] }
  0x18   : > { %v253_v6 = vld [vmem:[%s237_s14 + $0x20] sm:$0xff]  ;;  %v257_v8 = vpack.c.bf16 %v250_v5, %v249_v4  ;;  %v254_v9 = vld [vmem:[%s237_s14 + $0x28] sm:$0xff]  ;;  %v252_v12 = vld [vmem:[%s237_s14 + $0x18] sm:$0xff] }
  0x19   : > { %815 = vmatpush3.bf16.msra.mxu0 %v926_v2  ;;  %833 = vmatpush3.bf16.msra.mxu1 %v926_v2  ;;  %v259_v10 = vpack.c.bf16 %v254_v9, %v253_v6  ;;  %v255_v13 = vld [vmem:[%s237_s14 + $0x30] sm:$0xff]  ;;  %v256_v14 = vld [vmem:[%s237_s14 + $0x38] sm:$0xff]  ;;  %v258_v15 = vpack.c.bf16 %v252_v12, %v251_v11  ;;  %v782_v4 = vld [vmem:[%s1233_s3] ss:$0 sm:$0xff] }
  0x1a   : > { %816 = vmatprep.subr.bf16.mxu0 %v927_v3  ;;  %830 = vmatprep.subr.bf16.mxu1 %v927_v3  ;;  %v260_v16 = vpack.c.bf16 %v256_v14, %v255_v13 }
  0x1b   : > { %820 = vmatprep.mubr.msk.bf16.mxu0 %vm300_vm0, %v257_v8  ;;  %824 = vmatprep.mubr.msk.bf16.mxu1 %vm300_vm0, %v259_v10 }
  0x1d   : > { %817 = vmatpush3.bf16.msra.mxu0 %v927_v3  ;;  %834 = vmatpush3.bf16.msra.mxu1 %v927_v3 }
  0x1e   : > { %818 = vmatprep.subr.bf16.mxu0 %v928_v7  ;;  %831 = vmatprep.subr.bf16.mxu1 %v928_v7 }
  0x21   : > { %819 = vmatpush3.bf16.msra.mxu0 %v928_v7  ;;  %835 = vmatpush3.bf16.msra.mxu1 %v928_v7 }
  0x24   : > { %821 = vmatmul.mubr.msk.bf16.vlgmr.msra.gmra.mxu0 %vm300_vm0, %v258_v15  ;;  %825 = vmatmul.mubr.msk.bf16.vlgmr.msra.gmra.mxu1 %vm300_vm0, %v260_v16 }
  0xe4   : > { %v822_v18 = vpop.f32.mrf.mxu0  ;;  %v826_v19 = vpop.f32.mrf.mxu1 }
  0xe5   : > { %v356_v20 = vadd.f32 %v822_v18, %v773_v17  ;;  %v372_v32 = vadd.f32 %v826_v19, %v773_v17 }
  0xe6   : > { %v347_v21 = vpop.f32.mrf.mxu0  ;;  %v363_v22 = vpop.f32.mrf.mxu1 }
  0xe7   : > { %v388_v23 = vmul.f32 0.5, %v356_v20  ;;  %v348_v24 = vadd.f32 %v773_v17, %v347_v21  ;;  %v364_v25 = vadd.f32 %v773_v17, %v363_v22  ;;  %v392_v38 = vmul.f32 0.5, %v372_v32 }
  0xe8   : > { %v823_v26 = vpop.f32.mrf.mxu0  ;;  %v827_v27 = vpop.f32.mrf.mxu1 }
  0xe9   : > { %929 = vtanh.f32 %v388_v23  ;;  %v386_v28 = vmul.f32 0.5, %v348_v24  ;;  %v359_v29 = vadd.f32 %v823_v26, %v773_v17  ;;  %v390_v30 = vmul.f32 0.5, %v364_v25 }
  0xea   : > { %v350_v31 = vpop.f32.mrf.mxu0  ;;  %v366_v33 = vpop.f32.mrf.mxu1  ;;  %v375_v36 = vadd.f32 %v827_v27, %v773_v17 }
  0xeb   : > { %931 = vtanh.f32 %v386_v28  ;;  %v389_v34 = vmul.f32 0.5, %v359_v29  ;;  %v351_v35 = vadd.f32 %v773_v17, %v350_v31  ;;  %v367_v37 = vadd.f32 %v773_v17, %v366_v33 }
  0xec   : > { %933 = vtanh.f32 %v390_v30  ;;  %v393_v40 = vmul.f32 0.5, %v375_v36 }
  0xed   : > { %935 = vtanh.f32 %v389_v34  ;;  %v387_v39 = vmul.f32 0.5, %v351_v35  ;;  %v391_v41 = vmul.f32 0.5, %v367_v37 }
  0xee   : > { %937 = vtanh.f32 %v392_v38 }
  0xef   : > { %939 = vtanh.f32 %v387_v39 }
  0xf0   : > { %941 = vtanh.f32 %v393_v40 }
  0xf1   : > { %943 = vtanh.f32 %v391_v41 }
  0xf2   : > { %945 = vtanh.f32 %v356_v20 }
  0xf3   : > { %947 = vtanh.f32 %v348_v24 }
  0xf4   : > { %949 = vtanh.f32 %v364_v25 }
  0xf5   : > { %951 = vtanh.f32 %v359_v29 }
  0xf6   : > { %v930_v42 = vpop.eup %929  ;;  %953 = vtanh.f32 %v351_v35 }
  0xf7   : > { %v404_v43 = vadd.f32 1.0, %v930_v42  ;;  %955 = vtanh.f32 %v367_v37 }
  0xf8   : > { %v932_v44 = vpop.eup %931  ;;  %957 = vtanh.f32 %v372_v32 }
  0xf9   : > { %v412_v45 = vmul.f32 0.5, %v404_v43  ;;  %v402_v46 = vadd.f32 1.0, %v932_v44  ;;  %v934_v47 = vpop.eup %933  ;;  %959 = vtanh.f32 %v375_v36  ;;  %v783_v43 = vld [vmem:[#allocation2] ss:$0 sm:$0xff] }
  0xfa   : > { %v406_v49 = vadd.f32 1.0, %v934_v47  ;;  %v936_v50 = vpop.eup %935 }
  0xfb   : > { %430 = vrot.lane.b32.xlu1 %v412_v45, %s1049_s19  ;;  %v410_v48 = vmul.f32 0.5, %v402_v46  ;;  %v405_v51 = vadd.f32 1.0, %v936_v50  ;;  %v938_v53 = vpop.eup %937 }
  0xfc   : > { %v414_v52 = vmul.f32 0.5, %v406_v49  ;;  %v940_v55 = vpop.eup %939  ;;  %v408_v61 = vadd.f32 1.0, %v938_v53 }
  0xfd   : > { %426 = vrot.lane.b32.xlu0 %v410_v48, %s1049_s19  ;;  %v413_v54 = vmul.f32 0.5, %v405_v51  ;;  %v942_v56 = vpop.eup %941  ;;  %v403_v57 = vadd.f32 1.0, %v940_v55 }
  0xfe   : > { %v944_v58 = vpop.eup %943  ;;  %v409_v63 = vadd.f32 1.0, %v942_v56  ;;  %v416_v0 = vmul.f32 0.5, %v408_v61 }
  0xff   : > { %432 = vrot.lane.b32.xlu1 %v413_v54, %s1049_s19  ;;  %v407_v59 = vadd.f32 1.0, %v944_v58  ;;  %v411_v60 = vmul.f32 0.5, %v403_v57  ;;  %v946_v2 = vpop.eup %945 }
 0x100   : > { %v417_v1 = vmul.f32 0.5, %v409_v63  ;;  %v948_v6 = vpop.eup %947 }
 0x101   : > { %434 = vrot.lane.b32.xlu0 %v414_v52, %s1049_s19  ;;  %v415_v62 = vmul.f32 0.5, %v407_v59  ;;  %v950_v11 = vpop.eup %949 }
 0x102   : > { %v952_v13 = vpop.eup %951 }
 0x103   : > { %436 = vrot.lane.b32.xlu1 %v415_v62, %s1049_s19  ;;  %v954_v21 = vpop.eup %953 }
 0x104   : > { %v956_v25 = vpop.eup %955 }
 0x105   : > { %428 = vrot.lane.b32.xlu0 %v411_v60, %s1049_s19  ;;  %v958_v30 = vpop.eup %957 }
 0x106   : > { %v960_v35 = vpop.eup %959 }
 0x107   : > { %440 = vrot.lane.b32.xlu1 %v417_v1, %s1049_s19 }
 0x109   : > { %438 = vrot.lane.b32.xlu0 %v416_v0, %s1049_s19 }
 0x16d   : > { %v431_v3 = vpop.permute.xlu1 %430 }
 0x16e   : > { %v452_v5 = vmul.f32 %v946_v2, %v431_v3 }
 0x16f   : > { %v427_v7 = vpop.permute.xlu0 %426 }
 0x170   : > { %v467_v8 = vmul.f32 %v782_v4, %v452_v5  ;;  %v450_v9 = vmul.f32 %v948_v6, %v427_v7 }
 0x171   : > { %v433_v14 = vpop.permute.xlu1 %432 }
 0x172   : > { %v480_v10 = vsel %vm473_vm1, %v467_v8, 0.0  ;;  %v465_v12 = vmul.f32 %v782_v4, %v450_v9  ;;  %v453_v16 = vmul.f32 %v952_v13, %v433_v14 }
 0x173   : > { %481 = vadd.xlane.f32.xlu0 %v480_v10  ;;  %v435_v15 = vpop.permute.xlu0 %434 }
 0x174   : > { %v454_v17 = vmul.f32 %v950_v11, %v435_v15  ;;  %v474_v18 = vsel %vm473_vm1, %v465_v12, 0.0  ;;  %v468_v20 = vmul.f32 %v782_v4, %v453_v16 }
 0x175   : > { %v437_v26 = vpop.permute.xlu1 %436 }
 0x176   : > { %v469_v19 = vmul.f32 %v782_v4, %v454_v17  ;;  %v483_v27 = vsel %vm473_vm1, %v468_v20, 0.0  ;;  %v455_v28 = vmul.f32 %v956_v25, %v437_v26 }
 0x177   : > { %475 = vadd.xlane.f32.xlu0 %v474_v18  ;;  %v429_v22 = vpop.permute.xlu0 %428 }
 0x178   : > { %v451_v23 = vmul.f32 %v954_v21, %v429_v22  ;;  %v486_v24 = vsel %vm473_vm1, %v469_v19, 0.0  ;;  %v470_v34 = vmul.f32 %v782_v4, %v455_v28 }
 0x179   : > { %487 = vadd.xlane.f32.xlu1 %v486_v24  ;;  %v441_v36 = vpop.permute.xlu1 %440 }
 0x17a   : > { %v466_v29 = vmul.f32 %v782_v4, %v451_v23  ;;  %v457_v37 = vmul.f32 %v960_v35, %v441_v36  ;;  %v489_v38 = vsel %vm473_vm1, %v470_v34, 0.0 }
 0x17b   : > { %484 = vadd.xlane.f32.xlu0 %v483_v27  ;;  %v439_v31 = vpop.permute.xlu0 %438 }
 0x17c   : > { %v456_v32 = vmul.f32 %v958_v30, %v439_v31  ;;  %v477_v33 = vsel %vm473_vm1, %v466_v29, 0.0  ;;  %v472_v41 = vmul.f32 %v782_v4, %v457_v37 }
 0x17d   : > { %478 = vadd.xlane.f32.xlu1 %v477_v33 }
 0x17e   : > { %v471_v39 = vmul.f32 %v782_v4, %v456_v32  ;;  %v495_v42 = vsel %vm473_vm1, %v472_v41, 0.0 }
 0x17f   : > { %490 = vadd.xlane.f32.xlu0 %v489_v38 }
 0x180   : > { %v492_v40 = vsel %vm473_vm1, %v471_v39, 0.0 }
 0x181   : > { %493 = vadd.xlane.f32.xlu1 %v492_v40 }
 0x183   : > { %496 = vadd.xlane.f32.xlu0 %v495_v42 }
 0x1fc   : > { %v482_v44 = vpop.xlane.xlu0 %481 }
 0x1fd   : > { %v507_v45 = vadd.f32 %v783_v43, %v482_v44 }
 0x1ff   : > { %516 = vst.msk [vmem:[%s1151_s29 + $0x10] sm:$0xff] %vm513_vm2, %v507_v45 }
 0x200   : > { %v476_v46 = vpop.xlane.xlu0 %475 }
 0x201   : > { %v505_v47 = vadd.f32 %v783_v43, %v476_v46 }
 0x202   : > { %v488_v48 = vpop.xlane.xlu1 %487 }
 0x203   : > { %514 = vst.msk [vmem:[%s1151_s29] sm:$0xff] %vm513_vm2, %v505_v47  ;;  %v509_v49 = vadd.f32 %v783_v43, %v488_v48 }
 0x204   : > { %v485_v50 = vpop.xlane.xlu0 %484 }
 0x205   : > { %v508_v51 = vadd.f32 %v783_v43, %v485_v50  ;;  %518 = vst.msk [vmem:[%s1151_s29 + $0x20] sm:$0xff] %vm513_vm2, %v509_v49 }
 0x206   : > { %v479_v52 = vpop.xlane.xlu1 %478 }
 0x207   : > { %517 = vst.msk [vmem:[%s1151_s29 + $0x18] sm:$0xff] %vm513_vm2, %v508_v51  ;;  %v506_v53 = vadd.f32 %v783_v43, %v479_v52 }
 0x208   : > { %v491_v54 = vpop.xlane.xlu0 %490 }
 0x209   : > { %515 = vst.msk [vmem:[%s1151_s29 + $0x8] sm:$0xff] %vm513_vm2, %v506_v53  ;;  %v510_v55 = vadd.f32 %v783_v43, %v491_v54 }
 0x20a   : > { %v494_v56 = vpop.xlane.xlu1 %493 }
 0x20b   : > { %519 = vst.msk [vmem:[%s1151_s29 + $0x28] sm:$0xff] %vm513_vm2, %v510_v55  ;;  %v511_v57 = vadd.f32 %v783_v43, %v494_v56  ;;  %528 = sbr.rel (!%p1108_p4) target bundleno = 567 (0x237), region = 44 }
 0x20c   : > { %v497_v58 = vpop.xlane.xlu0 %496 }
 0x20d   : > { %520 = vst.msk [vmem:[%s1151_s29 + $0x30] sm:$0xff] %vm513_vm2, %v511_v57  ;;  %v512_v59 = vadd.f32 %v783_v43, %v497_v58 }
 0x20f   : > { %521 = vst.msk [vmem:[%s1151_s29 + $0x38] sm:$0xff] %vm513_vm2, %v512_v59 }
 0x210   : > { %s1244_s20 = smov (!%p531_p8, %s530_s20), 8 }
 0x211   : > { %s786_s10 = sshll.u32 %s1244_s20, 7 }
 0x212   : > { %p789_p9 = scmp.eq.s32.totalorder %s786_s10, 0 }
 0x213   : > { %s1182_s11 = sshrl.u32 (!%p789_p9), %s1244_s20, 3 }
 0x214   : > { %539 = sbr.rel (%p789_p9) target bundleno = 567 (0x237), region = 48  ;;  %p790_p10 = scmp.le.s32.totalorder (!%p789_p9), %s1182_s11, 0 }
 0x219   : > { %722 = sbr.rel (%p790_p10) target bundleno = 550 (0x226), region = 124  ;;  %s1237_s4 = smov (!%p790_p10), %s1176_s9 }
 0x21a   : > { %s1238_s27 = smov (!%p790_p10), %s1151_s29  ;;  %s1191_s30 = smov (!%p790_p10), 0  }
 0x21b   : > { %s1193_s12 = smov (!%p790_p10), 0  }
 0x21e LB: >> { %v616_v60 = vld [vmem:[%s1023_s27] sm:$0xff]  ;;  %v618_v61 = vld [vmem:[%s1023_s27 + $0x8] sm:$0xff]  ;;  %v620_v62 = vld [vmem:[%s1023_s27 + $0x10] sm:$0xff]  ;;  %s632_s13 = sadd.s32 1, %s1027_s30  ;;  %s610_s12 = sadd.s32 1, %s1031_s12   ;;  %s1031_s12 = sphi %s1193_s12, %s610_s12   ;;  %s1027_s30 = sphi %s1191_s30, %s1239_s30   ;;  %s1023_s27 = sphi %s1238_s27, %s637_s27   ;;  %s1019_s4 = sphi %s1237_s4, %s638_s4  }
 0x21f   : >> { %617 = vst [vmem:[%s1019_s4] sm:$0xff] %v616_v60  ;;  %619 = vst [vmem:[%s1019_s4 + $0x8] sm:$0xff] %v618_v61  ;;  %v622_v63 = vld [vmem:[%s1023_s27 + $0x18] sm:$0xff]  ;;  %v624_v0 = vld [vmem:[%s1023_s27 + $0x20] sm:$0xff]  ;;  %p633_p11 = scmp.ge.s32.totalorder %s632_s13, %s1182_s11  ;;  %p609_p12 = scmp.ge.s32.totalorder %s610_s12, %s1182_s11 }
 0x220   : >> { %621 = vst [vmem:[%s1019_s4 + $0x10] sm:$0xff] %v620_v62  ;;  %v626_v1 = vld [vmem:[%s1023_s27 + $0x28] sm:$0xff]  ;;  %623 = vst [vmem:[%s1019_s4 + $0x18] sm:$0xff] %v622_v63  ;;  %v628_v2 = vld [vmem:[%s1023_s27 + $0x30] sm:$0xff] }
 0x221   : >> { %625 = vst [vmem:[%s1019_s4 + $0x20] sm:$0xff] %v624_v0  ;;  %627 = vst [vmem:[%s1019_s4 + $0x28] sm:$0xff] %v626_v1  ;;  %v630_v3 = vld [vmem:[%s1023_s27 + $0x38] sm:$0xff]  ;;  %s1246_s13 = smov (%p633_p11, %s632_s13), 0  ;;  %612 = sbr.rel (!%p609_p12) target bundleno = 542 (0x21e), region = 130 }
 0x222   : >> { %629 = vst [vmem:[%s1019_s4 + $0x30] sm:$0xff] %v628_v2  ;;  %631 = vst [vmem:[%s1019_s4 + $0x38] sm:$0xff] %v630_v3  ;;  %s791_s14 = sshll.u32 %s1246_s13, 6  ;;  %s1239_s30 = smov %s1246_s13 }
 0x223   : >> { %s637_s27 = scalar_lea.vmem %s1151_s29, %s791_s14 [#allocation3]   ;;  %s638_s4 = scalar_lea.vmem %s1176_s9, %s791_s14  }
 0x226 PF: > { %s1212_s15 = sand.u32 7, %s1244_s20   ;;  %s802_s16 = sshll.u32 %s1182_s11, 6 }
 0x227   : > { %s643_s17 = scalar_lea.vmem %s1151_s29, %s802_s16 [#allocation3]   ;;  %s645_s18 = scalar_lea.vmem %s1176_s9, %s802_s16  }
 0x228   : > { %p796_p13 = scmp.le.s32.totalorder %s1212_s15, 0 }
 0x229   : > { %s1033_s19 = smov (!%p796_p13), %s645_s18   ;;  %s1037_s22 = smov (!%p796_p13), %s643_s17  }
 0x22a   : > { %736 = sbr.rel (%p796_p13) target bundleno = 567 (0x237), region = 135  ;;  %s1041_s24 = smov (!%p796_p13), 0  }
 0x22b   : > { %s1045_s25 = smov (!%p796_p13), 0  }
 0x22f LB: >> { %v655_v4 = vld [vmem:[%s1039_s22] sm:$0xff]  ;;  %s657_s28 = sadd.s32 1, %s1043_s24  ;;  %s649_s25 = sadd.s32 1, %s1047_s25   ;;  %s1047_s25 = sphi %s1045_s25, %s649_s25   ;;  %s1043_s24 = sphi %s1041_s24, %s1042_s24   ;;  %s1039_s22 = sphi %s1037_s22, %s662_s22   ;;  %s1035_s19 = sphi %s1033_s19, %s663_s19  }
 0x230   : >> { %656 = vst [vmem:[%s1035_s19] sm:$0xff] %v655_v4  ;;  %p658_p0 = scmp.ge.s32.totalorder %s657_s28, %s1212_s15  ;;  %p648_p1 = scmp.ge.s32.totalorder %s649_s25, %s1212_s15 }
 0x232   : >> { %s1248_s28 = smov (%p658_p0, %s657_s28), 0  ;;  %651 = sbr.rel (!%p648_p1) target bundleno = 559 (0x22f), region = 141 }
 0x233   : >> { %s797_s29 = sshll.u32 %s1248_s28, 3  ;;  %s1042_s24 = smov %s1248_s28  }
 0x234   : >> { %s662_s22 = scalar_lea.vmem %s643_s17, %s797_s29 [#allocation3]   ;;  %s663_s19 = scalar_lea.vmem %s645_s18, %s797_s29  }
 0x237 PF: > { %p14_p2 = scmp.ge.s32.totalorder %s1098_s23, 6   ;;  %s1240_s20 = smov %s1011_s21 }
 0x238   : > { %s1241_s21 = smov %s1106_s26  ;;  %s1242_s22 = smov %s1098_s23 }
 0x239   :  { %16 = sbr.rel (!%p14_p2) target bundleno = 5 (0x5), region = 152 }

</bundles_post_ra>
